<compile_context>
chip_gen: v7x
topology: tpu7x:2x2x1
jax: 0.10.0
libtpu: 0.0.40
codegen_flags: <defaults>
</compile_context>

<pallas_src>
import jax
import jax.numpy as jnp
from jax.experimental import pallas as pl
from jax.experimental.pallas import tpu as pltpu


# ----------------------------------------------------------------------------
# Kernel bodies
# ----------------------------------------------------------------------------
def _kernel_batch_folded(cls_ref, x_ref, o_ref):
    """Full-sequence blocks folding TB batch elements; grid = (ceil(B/TB),).

    cls_ref: (1, 1, D)   x_ref: (TB, N, D)   o_ref: (TB, N+1, D)
    """
    tb, _, d = o_ref.shape
    n = x_ref.shape[1]
    # Row 0 of every batch element in the block: the class token.
    o_ref[:, pl.ds(0, 1), :] = jnp.broadcast_to(cls_ref[...], (tb, 1, d))
    # Rows 1..N: the patch embeddings (single offset-by-1 store; HBM-bound op).
    o_ref[:, pl.ds(1, n), :] = x_ref[...]


def _kernel_seq_tiled_rolled(cls_ref, x_ref, o_ref, carry_ref):
    """Sequence-tiled path, 32-bit dtypes: aligned full store via XLU sublane
    roll + one-row overwrite of row 0.  Boundary row carried in VMEM scratch.

    cls_ref: (1, 1, D)  x_ref: (1, tn, D)  o_ref: (1, tn, D)  carry: (1, 1, D)
    """
    j = pl.program_id(1)
    tn = o_ref.shape[1]

    @pl.when(j == 0)
    def _():
        # First tile of every batch element starts with the class token.
        carry_ref[...] = cls_ref[...]

    x_blk = x_ref[0, :, :]                                # (tn, D)
    # Shift every row down by one sublane (XLU; free slot vs the store path).
    o_ref[0, :, :] = pltpu.roll(x_blk, shift=1, axis=0)   # full aligned store
    o_ref[0, pl.ds(0, 1), :] = carry_ref[0]               # overwrite row 0
    # Carry the last patch row of this tile into the next output tile.
    carry_ref[0] = x_blk[tn - 1:, :]


def _kernel_seq_tiled_shifted(cls_ref, x_ref, o_ref, carry_ref):
    """Sequence-tiled path, packed dtypes (bf16/int8): offset-by-1 stores
    (a 1-row roll on packed sublanes is not guaranteed to stay on the XLU)."""
    j = pl.program_id(1)
    tn = o_ref.shape[1]

    @pl.when(j == 0)
    def _():
        carry_ref[...] = cls_ref[...]

    o_ref[0, pl.ds(0, 1), :] = carry_ref[0]
    o_ref[0, pl.ds(1, tn - 1), :] = x_ref[0, pl.ds(0, tn - 1), :]
    carry_ref[0] = x_ref[0, pl.ds(tn - 1, 1), :]


# ----------------------------------------------------------------------------
# Wrapper
# ----------------------------------------------------------------------------
def class_token_forward(x, cls_token, *, target_block_bytes=2 * 1024 * 1024):
    """x: [B, N, D], cls_token: [1, 1, D] -> [B, N+1, D] (cls at row 0)."""
    B, N, D = x.shape
    assert cls_token.shape == (1, 1, D), cls_token.shape
    cls_token = cls_token.astype(x.dtype)

    itemsize = jnp.dtype(x.dtype).itemsize
    sub = 8 * (4 // itemsize)            # sublane tiling: 8 (f32) / 16 (bf16) / 32 (i8)
    row_bytes = D * itemsize
    elem_bytes = (N + 1) * row_bytes     # one batch element of the (larger) output

    out_shape = jax.ShapeDtypeStruct((B, N + 1, D), x.dtype)

    if elem_bytes <= target_block_bytes:
        # --- Batch-folded path (typical ViT shapes): full-seq blocks of TB
        #     batch elements, single parallel grid axis. -----------------------
        tb = int(max(1, min(B, target_block_bytes // max(elem_bytes, 1))))
        grid = (pl.cdiv(B, tb),)
        return pl.pallas_call(
            _kernel_batch_folded,
            out_shape=out_shape,
            grid=grid,
            in_specs=[
                pl.BlockSpec((1, 1, D), lambda i: (0, 0, 0)),
                pl.BlockSpec((tb, N, D), lambda i: (i, 0, 0)),
            ],
            out_specs=pl.BlockSpec((tb, N + 1, D), lambda i: (i, 0, 0)),
            compiler_params=pltpu.CompilerParams(
                dimension_semantics=("parallel",),
            ),
        )(cls_token, x)

    # --- Sequence-tiled path (one batch element per block exceeds the budget):
    #     grid (B, seq_tiles), boundary row carried in VMEM scratch. -----------
    rows_target = max(sub, (target_block_bytes // max(row_bytes, 1)) // sub * sub)
    cap = (N // sub) * sub if N >= sub else sub
    tn = int(max(sub, min(rows_target, cap)))

    # Prefer a tile size that does NOT divide N: then ceil((N+1)/tn)==ceil(N/tn)
    # and the last output tile never needs an extra (redundant) x-block fetch.
    tn_pick = tn
    while tn_pick > sub and N % tn_pick == 0:
        tn_pick -= sub
    if N % tn_pick != 0:
        tn = tn_pick

    num_out_tiles = pl.cdiv(N + 1, tn)
    num_x_tiles = pl.cdiv(N, tn)
    if num_out_tiles == num_x_tiles:
        x_index_map = lambda b, j: (b, j, 0)
    else:
        # Rare fallback (every sublane-multiple tile size divides N): clamp the
        # x index; the final tile re-reads one block but only its carried
        # boundary row is emitted (OOB output rows are masked by Pallas).
        x_index_map = lambda b, j: (b, jnp.minimum(j, num_x_tiles - 1), 0)

    # Static dtype gate (no try/except): roll body only for 32-bit dtypes.
    body = _kernel_seq_tiled_rolled if itemsize == 4 else _kernel_seq_tiled_shifted

    # Note: the last x block may be partial; its stale/garbage rows only ever
    # land in output rows >= N+1, which Pallas masks on writeback.
    return pl.pallas_call(
        body,
        out_shape=out_shape,
        grid=(B, num_out_tiles),
        in_specs=[
            pl.BlockSpec((1, 1, D), lambda b, j: (0, 0, 0)),
            pl.BlockSpec((1, tn, D), x_index_map),
        ],
        out_specs=pl.BlockSpec((1, tn, D), lambda b, j: (b, j, 0)),
        scratch_shapes=[pltpu.VMEM((1, 1, D), x.dtype)],
        compiler_params=pltpu.CompilerParams(
            dimension_semantics=("parallel", "arbitrary"),
        ),
    )(cls_token, x)


# ----------------------------------------------------------------------------
# Demo / self-check
# ----------------------------------------------------------------------------
if __name__ == "__main__":
    key = jax.random.PRNGKey(0)
    k_x, k_cls, k_x2, k_cls2 = jax.random.split(key, 4)

    # Small shape consistent with the module: [batch, num_patches, embed_dim].
    B, N, D = 2, 8, 32
    x = jax.random.normal(k_x, (B, N, D), dtype=jnp.float32)
    cls_token = jax.random.normal(k_cls, (1, 1, D), dtype=jnp.float32)  # nn.Parameter analogue

    out = jax.block_until_ready(class_token_forward(x, cls_token))
    ref = jnp.concatenate([jnp.broadcast_to(cls_token, (B, 1, D)), x], axis=1)
    assert out.shape == (B, N + 1, D)
    assert bool(jnp.array_equal(out, ref)), "batch-folded path mismatch vs reference"

    # Also exercise the sequence-tiled (large-activation) path by shrinking the
    # per-block budget so one batch element no longer fits in a single block.
    B2, N2, D2 = 2, 20, 128
    x2 = jax.random.normal(k_x2, (B2, N2, D2), dtype=jnp.float32)
    cls2 = jax.random.normal(k_cls2, (1, 1, D2), dtype=jnp.float32)
    out2 = jax.block_until_ready(
        class_token_forward(x2, cls2, target_block_bytes=4096)
    )
    ref2 = jnp.concatenate([jnp.broadcast_to(cls2, (B2, 1, D2)), x2], axis=1)
    assert out2.shape == (B2, N2 + 1, D2)
    assert bool(jnp.array_equal(out2, ref2)), "sequence-tiled path mismatch vs reference"

    print("KERNEL_OK")
</pallas_src>

<mosaic_0001>
module attributes {stable_mosaic.version = 11 : i64} {
  func.func @_kernel_batch_folded(%arg0: i32, %arg1: memref<1x1x32xf32, #tpu.memory_space<vmem>>, %arg2: memref<2x8x32xf32, #tpu.memory_space<vmem>>, %arg3: memref<2x9x32xf32, #tpu.memory_space<vmem>>) attributes {dimension_semantics = [#tpu.dimension_semantics<parallel>], iteration_bounds = array<i64: 1>, scalar_prefetch = 0 : i64, scratch_operands = 0 : i64, tpu.core_type = #tpu.core_type<tc>, window_params = [{pipeline_mode = #tpu.pipeline_mode<synchronous>, transform_indices = @transform_0, window_bounds = array<i64: 1, 1, 32>}, {transform_indices = @transform_1, window_bounds = array<i64: 2, 8, 32>}, {transform_indices = @transform_2, window_bounds = array<i64: 2, 9, 32>}]} {
    %c0 = arith.constant 0 : index
    %c0_0 = arith.constant 0 : index
    %c0_1 = arith.constant 0 : index
    %0 = vector.load %arg1[%c0, %c0_0, %c0_1] : memref<1x1x32xf32, #tpu.memory_space<vmem>>, vector<1x1x32xf32>
    %1 = vector.shape_cast %0 : vector<1x1x32xf32> to vector<1x1x32xf32>
    %2 = vector.broadcast %1 : vector<1x1x32xf32> to vector<2x1x32xf32>
    %c0_2 = arith.constant 0 : index
    %c0_3 = arith.constant 0 : index
    %c0_4 = arith.constant 0 : index
    %3 = vector.load %arg3[%c0_2, %c0_3, %c0_4] : memref<2x9x32xf32, #tpu.memory_space<vmem>>, vector<2x1x32xf32>
    tpu.vector_store %arg3[%c0_2, %c0_3, %c0_4], %2 {strides = array<i32>} : memref<2x9x32xf32, #tpu.memory_space<vmem>>, vector<2x1x32xf32>,
    %c0_5 = arith.constant 0 : index
    %c0_6 = arith.constant 0 : index
    %c0_7 = arith.constant 0 : index
    %4 = vector.load %arg2[%c0_5, %c0_6, %c0_7] : memref<2x8x32xf32, #tpu.memory_space<vmem>>, vector<2x8x32xf32>
    %c0_8 = arith.constant 0 : index
    %c1 = arith.constant 1 : index
    %c0_9 = arith.constant 0 : index
    %5 = vector.load %arg3[%c0_8, %c1, %c0_9] : memref<2x9x32xf32, #tpu.memory_space<vmem>>, vector<2x8x32xf32>
    tpu.vector_store %arg3[%c0_8, %c1, %c0_9], %4 {strides = array<i32>} : memref<2x9x32xf32, #tpu.memory_space<vmem>>, vector<2x8x32xf32>,
    return
  }
  func.func @transform_0(%arg0: i32) -> (i32, i32, i32) {
    %c0_i32 = arith.constant 0 : i32
    %c0_i32_0 = arith.constant 0 : i32
    %c0_i32_1 = arith.constant 0 : i32
    %c0_i32_2 = arith.constant 0 : i32
    return %c0_i32, %c0_i32_0, %c0_i32_1 : i32, i32, i32
  }
  func.func @transform_1(%arg0: i32) -> (i32, i32, i32) {
    %c0_i32 = arith.constant 0 : i32
    %c0_i32_0 = arith.constant 0 : i32
    %c0_i32_1 = arith.constant 0 : i32
    return %arg0, %c0_i32, %c0_i32_0 : i32, i32, i32
  }
  func.func @transform_2(%arg0: i32) -> (i32, i32, i32) {
    %c0_i32 = arith.constant 0 : i32
    %c0_i32_0 = arith.constant 0 : i32
    %c0_i32_1 = arith.constant 0 : i32
    return %arg0, %c0_i32, %c0_i32_0 : i32, i32, i32
  }
}

</mosaic_0001>

<bundles_post_ra>
// kernel: tpu_custom_call.1
= control target key start
LH: loop header
LB: loop body
LE: loop exit
PB: predicated region body
PF: predicated region fallthrough
CT: control target
= control target key end

     0   :  { %7 = vsyncpa [#allocation3], 0  ;;  %s166_s0 = inlined_call_operand.hbm [shape: f32[1,1,32], index: 0, kind: input, shape index: {}]   ;;  %s167_s1 = inlined_call_operand.hbm [shape: f32[2,8,32], index: 1, kind: input, shape index: {}]   ;;  %s168_s2 = inlined_call_operand.vmem [shape: f32[2,9,32], index: 2, kind: output, shape index: {}]  }
   0x1   :  { %8 = vsyncpa [#allocation5], 0  ;;  %s104_s9 = smov [#allocation2]   ;;  %s105_s11 = smov [#allocation4]  }
   0x2   :  { %s15_s10 = sshll.u32 %s104_s9, 4  ;;  %s24_s12 = sshll.u32 %s105_s11, 4  ;;  %s16_s10 = int_to_ptr.vmem [resolvable:$true] %s15_s10  ;;  %s123_s12 = int_to_ptr.vmem [resolvable:$true] %s24_s12 }
   0x3   :  { %s56_s15 = scalar_lea.hbm %s166_s0, 16 }
   0x4   :  { %p57_p0 = scmp.ne.s32.totalorder %s166_s0, %s56_s15  ;;  %p60_p1 = scmp.lt.u32.totalorder %s56_s15, %s166_s0 }
   0x6   :  { %p62_p2 = pnand %p60_p1, %p57_p0 }
   0x8   :  { %65 = shalt.err (!%p62_p2)
}
   0x9   :  { %s66_s20 = scalar_lea.vmem %s16_s10, 16  ;;  %s70_s21 = scalar_lea.vmem %s16_s10, 32 }
   0xa   :  { %p67_p3 = scmp.ne.s32.totalorder %s16_s10, %s66_s20  ;;  %p71_p4 = scmp.lt.s32.totalorder %s16_s10, %s16_s10 }
   0xb   :  { %p72_p5 = scmp.lt.s32.totalorder %s70_s21, %s66_s20 }
   0xd   :  { %p73_p6 = por %p72_p5, %p71_p4 }
   0xf   :  { %p74_p7 = pnand %p73_p6, %p67_p3 }
  0x11   :  { %77 = shalt.err (!%p74_p7)
}
  0x12   :  { %18 = dma.hbm_to_vmem [thread:$0]  %s166_s0, 16, %s16_s10, [#allocation3]  }
  0x13   :  { %s78_s26 = scalar_lea.hbm %s167_s1, 256 }
  0x14   :  { %p79_p8 = scmp.ne.s32.totalorder %s167_s1, %s78_s26  ;;  %p82_p9 = scmp.lt.u32.totalorder %s78_s26, %s167_s1 }
  0x16   :  { %p84_p10 = pnand %p82_p9, %p79_p8 }
  0x18   :  { %87 = shalt.err (!%p84_p10)
}
  0x19   :  { %s88_s3 = scalar_lea.vmem %s123_s12, 256  ;;  %p93_p12 = scmp.lt.s32.totalorder %s123_s12, %s123_s12 }
  0x1a   :  { %p89_p11 = scmp.ne.s32.totalorder %s123_s12, %s88_s3  ;;  %p94_p13 = scmp.lt.s32.totalorder %s88_s3, %s88_s3 }
  0x1c   :  { %p95_p0 = por %p94_p13, %p93_p12 }
  0x1e   :  { %p96_p1 = pnand %p95_p0, %p89_p11 }
  0x20   :  { %99 = shalt.err (!%p96_p1)
}
  0x21   :  { %s106_s0 = smov 128   ;;  %s107_s4 = smov 8  }
  0x22   :  { %30 = dma.hbm_to_vmem [thread:$0]  %s167_s1, 256, %s123_s12, [#allocation5], %s106_s0, %s106_s0, %s107_s4  }
  0x23   :  { %100 = dma.done.wait [#allocation3], 16  }
  0x24   :  { %101 = vsyncadd [#allocation3], 4294967280 }
  0x25   :  { %102 = dma.done.wait [#allocation5], 256  }
  0x26   :  { %103 = vsyncadd [#allocation5], 4294967040  ;;  %vm38_vm0 = vcmask 253952   ;;  %vm43_vm1 = vcmask 261120   ;;  %v37_v0 = vld [vmem:[#allocation2] sm:$0x1] }
  0x27   :  { %v41_v1 = vld [vmem:[#allocation4] sm:$0xff]  ;;  %v42_v2 = vld [vmem:[#allocation4 + $0x8] sm:$0xff]  ;;  %39 = vst.msk [vmem:[%s168_s2] sm:$0x1] %vm38_vm0, %v37_v0  ;;  %40 = vst.msk [vmem:[%s168_s2 + $0x10] sm:$0x1] %vm38_vm0, %v37_v0 }
  0x28   :  { %44 = vst.msk [vmem:[%s168_s2 + $0x1] sm:$0xff] %vm43_vm1, %v41_v1  ;;  %45 = vst.msk [vmem:[%s168_s2 + $0x11] sm:$0xff] %vm43_vm1, %v42_v2 }
  0x29   :  { %50 = vsyncpa [#allocation3], 1 }
  0x2a   :  { %51 = vsyncpa [#allocation5], 1 }

</bundles_post_ra>
